<compile_context>
chip_gen: v7x
topology: tpu7x:2x2x1
jax: 0.10.0
libtpu: 0.0.40
codegen_flags: <defaults>
</compile_context>

<pallas_src>
import functools

import jax
import jax.numpy as jnp
from jax.experimental import pallas as pl
from jax.experimental.pallas import tpu as pltpu


# ----------------------------- model dimensions ------------------------------
OBS_DIM = 16       # env.spec.observation_dim
ACT_DIM = 8        # env.spec.action_dim
SENSORY = 32       # rnn_cell.sensory_size
STATE = 32         # rnn_cell.state_size
CELL_OUT = 16      # rnn_cell.output_size (motor neurons = first CELL_OUT state units)
BATCH = 2
SEQ = 8


# --------------------------------- kernel ------------------------------------
def ncp_kernel(
    x_ref,        # (T*B, OBS)       time-major flattened observations
    w_comb_ref,   # (OBS, STATE)     diag(1/scale) @ W_in @ W_ih  (pre-folded)
    b_comb_ref,   # (1, STATE)       (b_in - shift/scale @ W_in) @ W_ih + b_rnn
    w_hh_ref,     # (STATE, STATE)   recurrent weight (pre-transposed)
    w_out_ref,    # (CELL_OUT, ACT)  W_out * out_scale (pre-folded)
    b_out_ref,    # (1, ACT)         b_out * out_scale + out_shift
    o_ref,        # (T*B, ACT)       output, written once
    z_ref,        # scratch (T*B, STATE)
    h_buf_ref,    # scratch (T*B, CELL_OUT)
    *,
    batch, seq, state, cell_out,
):
    # (1) All non-recurrent input work for every timestep, as one MXU matmul.
    z_ref[...] = (
        jnp.dot(x_ref[...], w_comb_ref[...], preferred_element_type=jnp.float32)
        + b_comb_ref[...]
    )

    # (2) The truly serial recurrence: h_{t} = tanh(z_t + h_{t-1} @ W_hh).
    #     Fully unrolled (seq is static) -> flat basic block, static slices.
    h = jnp.zeros((batch, state), jnp.float32)
    for t in range(seq):
        row = t * batch
        pre = z_ref[pl.ds(row, batch), :] + jnp.dot(
            h, w_hh_ref[...], preferred_element_type=jnp.float32
        )
        h = jnp.tanh(pre)
        h_buf_ref[pl.ds(row, batch), :] = h[:, :cell_out]   # motor-neuron slice

    # (3) Output projection for all timesteps at once (affine already folded).
    o_ref[...] = (
        jnp.dot(h_buf_ref[...], w_out_ref[...], preferred_element_type=jnp.float32)
        + b_out_ref[...]
    )


# -------------------------------- wrapper -------------------------------------
@jax.jit
def ncp_forward(x, params):
    """x: (B, T, OBS_DIM) float32 -> (B, T, ACT_DIM) float32."""
    B, T, _ = x.shape

    # --- fold input normalization into fc_input, then compose with the cell's
    #     input matmul (linear o linear): Z = X @ W_comb + b_comb
    inv_scale = 1.0 / (params["in_scale"] + 1e-8)                       # (1, OBS)
    w_in_eff = params["w_in"] * inv_scale.reshape(-1, 1)                # (OBS, SENSORY)
    b_in_eff = params["b_in"] - (params["in_shift"] * inv_scale) @ params["w_in"]
    w_comb = w_in_eff @ params["w_ih"]                                  # (OBS, STATE)
    b_comb = b_in_eff @ params["w_ih"] + params["b_rnn"]                # (1, STATE)

    # --- fold output affine into fc_output
    w_out_eff = params["w_out"] * params["out_scale"]                   # (CELL_OUT, ACT)
    b_out_eff = params["b_out"] * params["out_scale"] + params["out_shift"]

    # time-major flatten: rows [t*B, (t+1)*B) hold timestep t
    x_flat = jnp.transpose(x, (1, 0, 2)).reshape(T * B, OBS_DIM)

    kernel = functools.partial(
        ncp_kernel, batch=B, seq=T, state=STATE, cell_out=CELL_OUT
    )
    vmem_specs = [
        pl.BlockSpec(memory_space=pltpu.MemorySpace.VMEM) for _ in range(6)
    ]

    out_flat = pl.pallas_call(
        kernel,
        out_shape=jax.ShapeDtypeStruct((T * B, ACT_DIM), jnp.float32),
        in_specs=vmem_specs,
        out_specs=pl.BlockSpec(memory_space=pltpu.MemorySpace.VMEM),
        scratch_shapes=[
            pltpu.VMEM((T * B, STATE), jnp.float32),      # Z for all timesteps
            pltpu.VMEM((T * B, CELL_OUT), jnp.float32),   # motor slices of H
        ],
    )(x_flat, w_comb, b_comb, params["w_hh"], w_out_eff, b_out_eff)

    return jnp.transpose(out_flat.reshape(T, B, ACT_DIM), (1, 0, 2))    # (B, T, ACT)


# ------------------------- pure-JAX reference (check) -------------------------
def ncp_reference(x, params):
    B, T, _ = x.shape
    h = jnp.zeros((B, STATE), jnp.float32)
    outs = []
    for t in range(T):
        xt = (x[:, t] - params["in_shift"][0]) / (params["in_scale"][0] + 1e-8)
        z = xt @ params["w_in"] + params["b_in"][0]
        h = jnp.tanh(z @ params["w_ih"] + h @ params["w_hh"] + params["b_rnn"][0])
        y = h[:, :CELL_OUT] @ params["w_out"] + params["b_out"][0]
        outs.append(y * params["out_scale"][0] + params["out_shift"][0])
    return jnp.stack(outs, axis=1)


# ----------------------------- parameter init ---------------------------------
def init_params(key):
    ks = jax.random.split(key, 8)
    u = lambda k, shape, fan_in: jax.random.uniform(
        k, shape, jnp.float32, -1.0 / jnp.sqrt(fan_in), 1.0 / jnp.sqrt(fan_in)
    )
    return dict(
        # transformations (normally identity; made non-trivial to exercise the path)
        in_shift=jnp.linspace(-0.1, 0.1, OBS_DIM, dtype=jnp.float32).reshape(1, OBS_DIM),
        in_scale=jnp.full((1, OBS_DIM), 1.5, jnp.float32),
        out_shift=jnp.linspace(-0.05, 0.05, ACT_DIM, dtype=jnp.float32).reshape(1, ACT_DIM),
        out_scale=jnp.full((1, ACT_DIM), 2.0, jnp.float32),
        # fc_input_layer (obs -> sensory), stored pre-transposed (in, out)
        w_in=u(ks[0], (OBS_DIM, SENSORY), OBS_DIM),
        b_in=u(ks[1], (1, SENSORY), OBS_DIM),
        # NCP cell weights, pre-transposed (in, out)
        w_ih=u(ks[2], (SENSORY, STATE), SENSORY),
        w_hh=u(ks[3], (STATE, STATE), STATE),
        b_rnn=u(ks[4], (1, STATE), STATE),
        # fc_output_layer (cell output -> act), pre-transposed (in, out)
        w_out=u(ks[5], (CELL_OUT, ACT_DIM), CELL_OUT),
        b_out=u(ks[6], (1, ACT_DIM), CELL_OUT),
    )


if __name__ == "__main__":
    key = jax.random.PRNGKey(0)
    k_param, k_x = jax.random.split(key)
    params = init_params(k_param)
    x = jax.random.normal(k_x, (BATCH, SEQ, OBS_DIM), jnp.float32)

    out = jax.block_until_ready(ncp_forward(x, params))
    ref = ncp_reference(x, params)

    assert out.shape == (BATCH, SEQ, ACT_DIM), out.shape
    assert jnp.allclose(out, ref, atol=1e-3, rtol=1e-3), float(jnp.max(jnp.abs(out - ref)))

    print("KERNEL_OK")
</pallas_src>

<mosaic_0001>
module attributes {stable_mosaic.version = 11 : i64} {
  func.func @ncp_kernel(%arg0: memref<16x16xf32, #tpu.memory_space<vmem>>, %arg1: memref<16x32xf32, #tpu.memory_space<vmem>>, %arg2: memref<1x32xf32, #tpu.memory_space<vmem>>, %arg3: memref<32x32xf32, #tpu.memory_space<vmem>>, %arg4: memref<16x8xf32, #tpu.memory_space<vmem>>, %arg5: memref<1x8xf32, #tpu.memory_space<vmem>>, %arg6: memref<16x8xf32, #tpu.memory_space<vmem>>, %arg7: memref<16x32xf32, #tpu.memory_space<vmem>>, %arg8: memref<16x16xf32, #tpu.memory_space<vmem>>) attributes {dimension_semantics = [], scalar_prefetch = 0 : i64, scratch_operands = 2 : i64, tpu.core_type = #tpu.core_type<tc>} {
    %c0 = arith.constant 0 : index
    %c0_0 = arith.constant 0 : index
    %0 = vector.load %arg0[%c0, %c0_0] : memref<16x16xf32, #tpu.memory_space<vmem>>, vector<16x16xf32>
    %c0_1 = arith.constant 0 : index
    %c0_2 = arith.constant 0 : index
    %1 = vector.load %arg1[%c0_1, %c0_2] : memref<16x32xf32, #tpu.memory_space<vmem>>, vector<16x32xf32>
    %cst = arith.constant dense<0.000000e+00> : vector<16x32xf32>
    %2 = tpu.matmul %0, %1, %cst {dimension_numbers = #tpu.dot_dimension_numbers<[1], [0], [0], [1], [0, 0, 1, 1], [], []>} : vector<16x16xf32>, vector<16x32xf32>, vector<16x32xf32> -> vector<16x32xf32>
    %c0_3 = arith.constant 0 : index
    %c0_4 = arith.constant 0 : index
    %3 = vector.load %arg2[%c0_3, %c0_4] : memref<1x32xf32, #tpu.memory_space<vmem>>, vector<1x32xf32>
    %4 = vector.broadcast %3 : vector<1x32xf32> to vector<16x32xf32>
    %5 = arith.addf %2, %4 : vector<16x32xf32>
    %c0_5 = arith.constant 0 : index
    %c0_6 = arith.constant 0 : index
    %6 = vector.load %arg7[%c0_5, %c0_6] : memref<16x32xf32, #tpu.memory_space<vmem>>, vector<16x32xf32>
    tpu.vector_store %arg7[%c0_5, %c0_6], %5 {strides = array<i32>} : memref<16x32xf32, #tpu.memory_space<vmem>>, vector<16x32xf32>,
    %cst_7 = arith.constant 0.000000e+00 : f32
    %7 = vector.broadcast %cst_7 : f32 to vector<2x32xf32>
    %c0_8 = arith.constant 0 : index
    %c0_9 = arith.constant 0 : index
    %8 = vector.load %arg7[%c0_8, %c0_9] : memref<16x32xf32, #tpu.memory_space<vmem>>, vector<2x32xf32>
    %c0_10 = arith.constant 0 : index
    %c0_11 = arith.constant 0 : index
    %9 = vector.load %arg3[%c0_10, %c0_11] : memref<32x32xf32, #tpu.memory_space<vmem>>, vector<32x32xf32>
    %cst_12 = arith.constant dense<0.000000e+00> : vector<2x32xf32>
    %10 = tpu.matmul %7, %9, %cst_12 {dimension_numbers = #tpu.dot_dimension_numbers<[1], [0], [0], [1], [0, 0, 1, 1], [], []>} : vector<2x32xf32>, vector<32x32xf32>, vector<2x32xf32> -> vector<2x32xf32>
    %11 = arith.addf %8, %10 : vector<2x32xf32>
    %12 = math.tanh %11 : vector<2x32xf32>
    %13 = vector.extract_strided_slice %12 {offsets = [0, 0], sizes = [2, 16], strides = [1, 1]} : vector<2x32xf32> to vector<2x16xf32>
    %c0_13 = arith.constant 0 : index
    %c0_14 = arith.constant 0 : index
    %14 = vector.load %arg8[%c0_13, %c0_14] : memref<16x16xf32, #tpu.memory_space<vmem>>, vector<2x16xf32>
    tpu.vector_store %arg8[%c0_13, %c0_14], %13 {strides = array<i32>} : memref<16x16xf32, #tpu.memory_space<vmem>>, vector<2x16xf32>,
    %c2 = arith.constant 2 : index
    %c0_15 = arith.constant 0 : index
    %15 = vector.load %arg7[%c2, %c0_15] : memref<16x32xf32, #tpu.memory_space<vmem>>, vector<2x32xf32>
    %c0_16 = arith.constant 0 : index
    %c0_17 = arith.constant 0 : index
    %16 = vector.load %arg3[%c0_16, %c0_17] : memref<32x32xf32, #tpu.memory_space<vmem>>, vector<32x32xf32>
    %cst_18 = arith.constant dense<0.000000e+00> : vector<2x32xf32>
    %17 = tpu.matmul %12, %16, %cst_18 {dimension_numbers = #tpu.dot_dimension_numbers<[1], [0], [0], [1], [0, 0, 1, 1], [], []>} : vector<2x32xf32>, vector<32x32xf32>, vector<2x32xf32> -> vector<2x32xf32>
    %18 = arith.addf %15, %17 : vector<2x32xf32>
    %19 = math.tanh %18 : vector<2x32xf32>
    %20 = vector.extract_strided_slice %19 {offsets = [0, 0], sizes = [2, 16], strides = [1, 1]} : vector<2x32xf32> to vector<2x16xf32>
    %c2_19 = arith.constant 2 : index
    %c0_20 = arith.constant 0 : index
    %21 = vector.load %arg8[%c2_19, %c0_20] : memref<16x16xf32, #tpu.memory_space<vmem>>, vector<2x16xf32>
    tpu.vector_store %arg8[%c2_19, %c0_20], %20 {strides = array<i32>} : memref<16x16xf32, #tpu.memory_space<vmem>>, vector<2x16xf32>,
    %c4 = arith.constant 4 : index
    %c0_21 = arith.constant 0 : index
    %22 = vector.load %arg7[%c4, %c0_21] : memref<16x32xf32, #tpu.memory_space<vmem>>, vector<2x32xf32>
    %c0_22 = arith.constant 0 : index
    %c0_23 = arith.constant 0 : index
    %23 = vector.load %arg3[%c0_22, %c0_23] : memref<32x32xf32, #tpu.memory_space<vmem>>, vector<32x32xf32>
    %cst_24 = arith.constant dense<0.000000e+00> : vector<2x32xf32>
    %24 = tpu.matmul %19, %23, %cst_24 {dimension_numbers = #tpu.dot_dimension_numbers<[1], [0], [0], [1], [0, 0, 1, 1], [], []>} : vector<2x32xf32>, vector<32x32xf32>, vector<2x32xf32> -> vector<2x32xf32>
    %25 = arith.addf %22, %24 : vector<2x32xf32>
    %26 = math.tanh %25 : vector<2x32xf32>
    %27 = vector.extract_strided_slice %26 {offsets = [0, 0], sizes = [2, 16], strides = [1, 1]} : vector<2x32xf32> to vector<2x16xf32>
    %c4_25 = arith.constant 4 : index
    %c0_26 = arith.constant 0 : index
    %28 = vector.load %arg8[%c4_25, %c0_26] : memref<16x16xf32, #tpu.memory_space<vmem>>, vector<2x16xf32>
    tpu.vector_store %arg8[%c4_25, %c0_26], %27 {strides = array<i32>} : memref<16x16xf32, #tpu.memory_space<vmem>>, vector<2x16xf32>,
    %c6 = arith.constant 6 : index
    %c0_27 = arith.constant 0 : index
    %29 = vector.load %arg7[%c6, %c0_27] : memref<16x32xf32, #tpu.memory_space<vmem>>, vector<2x32xf32>
    %c0_28 = arith.constant 0 : index
    %c0_29 = arith.constant 0 : index
    %30 = vector.load %arg3[%c0_28, %c0_29] : memref<32x32xf32, #tpu.memory_space<vmem>>, vector<32x32xf32>
    %cst_30 = arith.constant dense<0.000000e+00> : vector<2x32xf32>
    %31 = tpu.matmul %26, %30, %cst_30 {dimension_numbers = #tpu.dot_dimension_numbers<[1], [0], [0], [1], [0, 0, 1, 1], [], []>} : vector<2x32xf32>, vector<32x32xf32>, vector<2x32xf32> -> vector<2x32xf32>
    %32 = arith.addf %29, %31 : vector<2x32xf32>
    %33 = math.tanh %32 : vector<2x32xf32>
    %34 = vector.extract_strided_slice %33 {offsets = [0, 0], sizes = [2, 16], strides = [1, 1]} : vector<2x32xf32> to vector<2x16xf32>
    %c6_31 = arith.constant 6 : index
    %c0_32 = arith.constant 0 : index
    %35 = vector.load %arg8[%c6_31, %c0_32] : memref<16x16xf32, #tpu.memory_space<vmem>>, vector<2x16xf32>
    tpu.vector_store %arg8[%c6_31, %c0_32], %34 {strides = array<i32>} : memref<16x16xf32, #tpu.memory_space<vmem>>, vector<2x16xf32>,
    %c8 = arith.constant 8 : index
    %c0_33 = arith.constant 0 : index
    %36 = vector.load %arg7[%c8, %c0_33] : memref<16x32xf32, #tpu.memory_space<vmem>>, vector<2x32xf32>
    %c0_34 = arith.constant 0 : index
    %c0_35 = arith.constant 0 : index
    %37 = vector.load %arg3[%c0_34, %c0_35] : memref<32x32xf32, #tpu.memory_space<vmem>>, vector<32x32xf32>
    %cst_36 = arith.constant dense<0.000000e+00> : vector<2x32xf32>
    %38 = tpu.matmul %33, %37, %cst_36 {dimension_numbers = #tpu.dot_dimension_numbers<[1], [0], [0], [1], [0, 0, 1, 1], [], []>} : vector<2x32xf32>, vector<32x32xf32>, vector<2x32xf32> -> vector<2x32xf32>
    %39 = arith.addf %36, %38 : vector<2x32xf32>
    %40 = math.tanh %39 : vector<2x32xf32>
    %41 = vector.extract_strided_slice %40 {offsets = [0, 0], sizes = [2, 16], strides = [1, 1]} : vector<2x32xf32> to vector<2x16xf32>
    %c8_37 = arith.constant 8 : index
    %c0_38 = arith.constant 0 : index
    %42 = vector.load %arg8[%c8_37, %c0_38] : memref<16x16xf32, #tpu.memory_space<vmem>>, vector<2x16xf32>
    tpu.vector_store %arg8[%c8_37, %c0_38], %41 {strides = array<i32>} : memref<16x16xf32, #tpu.memory_space<vmem>>, vector<2x16xf32>,
    %c10 = arith.constant 10 : index
    %c0_39 = arith.constant 0 : index
    %43 = vector.load %arg7[%c10, %c0_39] : memref<16x32xf32, #tpu.memory_space<vmem>>, vector<2x32xf32>
    %c0_40 = arith.constant 0 : index
    %c0_41 = arith.constant 0 : index
    %44 = vector.load %arg3[%c0_40, %c0_41] : memref<32x32xf32, #tpu.memory_space<vmem>>, vector<32x32xf32>
    %cst_42 = arith.constant dense<0.000000e+00> : vector<2x32xf32>
    %45 = tpu.matmul %40, %44, %cst_42 {dimension_numbers = #tpu.dot_dimension_numbers<[1], [0], [0], [1], [0, 0, 1, 1], [], []>} : vector<2x32xf32>, vector<32x32xf32>, vector<2x32xf32> -> vector<2x32xf32>
    %46 = arith.addf %43, %45 : vector<2x32xf32>
    %47 = math.tanh %46 : vector<2x32xf32>
    %48 = vector.extract_strided_slice %47 {offsets = [0, 0], sizes = [2, 16], strides = [1, 1]} : vector<2x32xf32> to vector<2x16xf32>
    %c10_43 = arith.constant 10 : index
    %c0_44 = arith.constant 0 : index
    %49 = vector.load %arg8[%c10_43, %c0_44] : memref<16x16xf32, #tpu.memory_space<vmem>>, vector<2x16xf32>
    tpu.vector_store %arg8[%c10_43, %c0_44], %48 {strides = array<i32>} : memref<16x16xf32, #tpu.memory_space<vmem>>, vector<2x16xf32>,
    %c12 = arith.constant 12 : index
    %c0_45 = arith.constant 0 : index
    %50 = vector.load %arg7[%c12, %c0_45] : memref<16x32xf32, #tpu.memory_space<vmem>>, vector<2x32xf32>
    %c0_46 = arith.constant 0 : index
    %c0_47 = arith.constant 0 : index
    %51 = vector.load %arg3[%c0_46, %c0_47] : memref<32x32xf32, #tpu.memory_space<vmem>>, vector<32x32xf32>
    %cst_48 = arith.constant dense<0.000000e+00> : vector<2x32xf32>
    %52 = tpu.matmul %47, %51, %cst_48 {dimension_numbers = #tpu.dot_dimension_numbers<[1], [0], [0], [1], [0, 0, 1, 1], [], []>} : vector<2x32xf32>, vector<32x32xf32>, vector<2x32xf32> -> vector<2x32xf32>
    %53 = arith.addf %50, %52 : vector<2x32xf32>
    %54 = math.tanh %53 : vector<2x32xf32>
    %55 = vector.extract_strided_slice %54 {offsets = [0, 0], sizes = [2, 16], strides = [1, 1]} : vector<2x32xf32> to vector<2x16xf32>
    %c12_49 = arith.constant 12 : index
    %c0_50 = arith.constant 0 : index
    %56 = vector.load %arg8[%c12_49, %c0_50] : memref<16x16xf32, #tpu.memory_space<vmem>>, vector<2x16xf32>
    tpu.vector_store %arg8[%c12_49, %c0_50], %55 {strides = array<i32>} : memref<16x16xf32, #tpu.memory_space<vmem>>, vector<2x16xf32>,
    %c14 = arith.constant 14 : index
    %c0_51 = arith.constant 0 : index
    %57 = vector.load %arg7[%c14, %c0_51] : memref<16x32xf32, #tpu.memory_space<vmem>>, vector<2x32xf32>
    %c0_52 = arith.constant 0 : index
    %c0_53 = arith.constant 0 : index
    %58 = vector.load %arg3[%c0_52, %c0_53] : memref<32x32xf32, #tpu.memory_space<vmem>>, vector<32x32xf32>
    %cst_54 = arith.constant dense<0.000000e+00> : vector<2x32xf32>
    %59 = tpu.matmul %54, %58, %cst_54 {dimension_numbers = #tpu.dot_dimension_numbers<[1], [0], [0], [1], [0, 0, 1, 1], [], []>} : vector<2x32xf32>, vector<32x32xf32>, vector<2x32xf32> -> vector<2x32xf32>
    %60 = arith.addf %57, %59 : vector<2x32xf32>
    %61 = math.tanh %60 : vector<2x32xf32>
    %62 = vector.extract_strided_slice %61 {offsets = [0, 0], sizes = [2, 16], strides = [1, 1]} : vector<2x32xf32> to vector<2x16xf32>
    %c14_55 = arith.constant 14 : index
    %c0_56 = arith.constant 0 : index
    %63 = vector.load %arg8[%c14_55, %c0_56] : memref<16x16xf32, #tpu.memory_space<vmem>>, vector<2x16xf32>
    tpu.vector_store %arg8[%c14_55, %c0_56], %62 {strides = array<i32>} : memref<16x16xf32, #tpu.memory_space<vmem>>, vector<2x16xf32>,
    %c0_57 = arith.constant 0 : index
    %c0_58 = arith.constant 0 : index
    %64 = vector.load %arg8[%c0_57, %c0_58] : memref<16x16xf32, #tpu.memory_space<vmem>>, vector<16x16xf32>
    %c0_59 = arith.constant 0 : index
    %c0_60 = arith.constant 0 : index
    %65 = vector.load %arg4[%c0_59, %c0_60] : memref<16x8xf32, #tpu.memory_space<vmem>>, vector<16x8xf32>
    %cst_61 = arith.constant dense<0.000000e+00> : vector<16x8xf32>
    %66 = tpu.matmul %64, %65, %cst_61 {dimension_numbers = #tpu.dot_dimension_numbers<[1], [0], [0], [1], [0, 0, 1, 1], [], []>} : vector<16x16xf32>, vector<16x8xf32>, vector<16x8xf32> -> vector<16x8xf32>
    %c0_62 = arith.constant 0 : index
    %c0_63 = arith.constant 0 : index
    %67 = vector.load %arg5[%c0_62, %c0_63] : memref<1x8xf32, #tpu.memory_space<vmem>>, vector<1x8xf32>
    %68 = vector.broadcast %67 : vector<1x8xf32> to vector<16x8xf32>
    %69 = arith.addf %66, %68 : vector<16x8xf32>
    %c0_64 = arith.constant 0 : index
    %c0_65 = arith.constant 0 : index
    %70 = vector.load %arg6[%c0_64, %c0_65] : memref<16x8xf32, #tpu.memory_space<vmem>>, vector<16x8xf32>
    tpu.vector_store %arg6[%c0_64, %c0_65], %69 {strides = array<i32>} : memref<16x8xf32, #tpu.memory_space<vmem>>, vector<16x8xf32>,
    return
  }
}

</mosaic_0001>

<bundles_post_ra>
// kernel: ncp_forward.1
= control target key start
LH: loop header
LB: loop body
LE: loop exit
PB: predicated region body
PF: predicated region fallthrough
CT: control target
= control target key end

     0   :  { %vm34_vm0 = vcmask 130048   ;;  %v1105_v3 = vmov 0.0|0.0   ;;  %vm1106_vm1 = vmmov 0   ;;  %v1107_v4 = vmov 0.0   ;;  %s1259_s1 = inlined_call_operand.vmem [shape: f32[16,32], index: 1, kind: input, shape index: {}]   ;;  %s1260_s0 = inlined_call_operand.vmem [shape: f32[16,16], index: 0, kind: input, shape index: {}]   ;;  %s1261_s3 = inlined_call_operand.vmem [shape: f32[32,32], index: 3, kind: input, shape index: {}]   ;;  %s1262_s2 = inlined_call_operand.vmem [shape: f32[1,32], index: 2, kind: input, shape index: {}]   ;;  %s1263_s4 = inlined_call_operand.vmem [shape: f32[16,8], index: 4, kind: input, shape index: {}]   ;;  %s1264_s5 = inlined_call_operand.vmem [shape: f32[1,8], index: 5, kind: input, shape index: {}]   ;;  %s1265_s6 = inlined_call_operand.vmem [shape: f32[16,8], index: 6, kind: output, shape index: {}]  }
   0x1   :  { %v25_v0 = vld [vmem:[%s1259_s1] sm:$0xff]  ;;  %v26_v1 = vld [vmem:[%s1259_s1 + $0x8] sm:$0xff]  ;;  %1034 = vmatprep.subr.bf16.mxu1 %v1105_v3  ;;  %943 = vmatprep.mubr.msk.f32.mxu1 %vm1106_vm1, %v1107_v4  ;;  %v122_v9 = vld [vmem:[%s1261_s3 + $0x10] sm:$0xff]  ;;  %vm116_vm2 = vcmask 261120   ;;  %vm199_vm3 = vcmask 123904   ;;  %vm860_vm4 = vcmask 64512  }
   0x2   :  { %v23_v2 = vld [vmem:[%s1260_s0] sm:$0xff]  ;;  %v1030_v5 = vpack.c.bf16 %v26_v1, %v25_v0  ;;  %v121_v7 = vld [vmem:[%s1261_s3 + $0x8] sm:$0xff]  ;;  %v123_v10 = vld [vmem:[%s1261_s3 + $0x18] sm:$0xff] }
   0x3   :  { %932 = vmatprep.mubr.msk.f32.mxu0 %vm34_vm0, %v23_v2  ;;  %v120_v6 = vld [vmem:[%s1261_s3] sm:$0xff]  ;;  %v24_v11 = vld [vmem:[%s1260_s0 + $0x8] sm:$0xff]  ;;  %v1174_v12 = vpack.c.bf16 %v123_v10, %v122_v9 }
   0x4   :  { %v1162_v8 = vpack.c.bf16 %v121_v7, %v120_v6  ;;  %1031 = vmatprep.subr.bf16.mxu0 %v1030_v5  ;;  %v867_v13 = vld [vmem:[%s1262_s2] ss:$0 sm:$0xff]  ;;  %v771_v55 = vld [vmem:[%s1263_s4 + $0x8] sm:$0xff] }
   0x5   :  { %1033 = vmatpush3.bf16.msra.mxu0 %v1030_v5  ;;  %v770_v54 = vld [vmem:[%s1263_s4] sm:$0xff] }
   0x6   :  { %1036 = vmatpush3.bf16.msra.mxu1 %v1162_v8  ;;  %1040 = vmatprep.subr.bf16.mxu0 %v1105_v3  ;;  %v1082_v56 = vpack.c.bf16 %v771_v55, %v770_v54  ;;  %v877_v63 = vld [vmem:[%s1264_s5] ss:$0 sm:$0xff] }
   0x7   :  { %1037 = vmatprep.subr.bf16.mxu1 %v1105_v3 }
   0x8   :  { %933 = vmatmul.mubr.msk.f32.vlgmr.msra.gmra.mrb[0].mxu0 %vm34_vm0, %v24_v11 }
   0x9   :  { %1042 = vmatpush3.bf16.msra.mxu0 %v1162_v8  ;;  %954 = vmatprep.mubr.msk.f32.mxu0 %vm1106_vm1, %v1107_v4 }
   0xa   :  { %1039 = vmatpush3.bf16.msra.mxu1 %v1174_v12  ;;  %1043 = vmatprep.subr.bf16.mxu0 %v1105_v3 }
   0xb   :  { %1046 = vmatprep.subr.bf16.mxu1 %v1105_v3 }
   0xd   :  { %944 = vmatmul.mubr.f32.vlgmr.msra.gmra.mrb[0].mxu1 %v1107_v4  ;;  %1045 = vmatpush3.bf16.msra.mxu0 %v1174_v12 }
   0xe   :  { %1048 = vmatpush3.bf16.msra.mxu1 %v1162_v8  ;;  %965 = vmatprep.mubr.msk.f32.mxu1 %vm1106_vm1, %v1107_v4 }
   0xf   :  { %1049 = vmatprep.subr.bf16.mxu1 %v1105_v3  ;;  %1052 = vmatprep.subr.bf16.mxu0 %v1105_v3 }
  0x12   :  { %1051 = vmatpush3.bf16.msra.mxu1 %v1174_v12 }
  0x13   :  { %1058 = vmatprep.subr.bf16.mxu1 %v1105_v3 }
  0xdb   :  { %v934_v14 = vpop.f32.mrb[0].mxu0 }
  0xdc   :  { %v113_v15 = vadd.f32 %v934_v14, %v867_v13  ;;  %v107_v16 = vpop.f32.mrb[1].mxu0 }
  0xdd   :  { %v108_v17 = vadd.f32 %v867_v13, %v107_v16 }
  0xde   :  { %118 = vst.msk [vmem:[#allocation2 + $0x8] sm:$0xff] %vm116_vm2, %v113_v15 }
  0xdf   :  { %117 = vst.msk [vmem:[#allocation2] sm:$0xff] %vm116_vm2, %v108_v17 }
  0xe0   :  { %v193_v18 = vpop.f32.mrb[0].mxu1 }
  0xe1   :  { %v945_v19 = vpop.f32.mrb[1].mxu1 }
  0xe5   :  { %v444_v38 = vld [vmem:[#allocation2 + $0x8] sm:$0x3]  ;;  %v525_v43 = vld [vmem:[#allocation2 + $0xa] sm:$0x3]  ;;  %v606_v49 = vld [vmem:[#allocation2 + $0xc] sm:$0x3] }
  0xe6   :  { %v119_v20 = vld [vmem:[#allocation2] sm:$0x3]  ;;  %v201_v23 = vld [vmem:[#allocation2 + $0x2] sm:$0x3]  ;;  %v282_v28 = vld [vmem:[#allocation2 + $0x4] sm:$0x3] }
  0xe7   :  { %v197_v21 = vadd.f32 %v193_v18, %v119_v20  ;;  %v363_v33 = vld [vmem:[#allocation2 + $0x6] sm:$0x3]  ;;  %v687_v57 = vld [vmem:[#allocation2 + $0xe] sm:$0x3] }
  0xe9   :  { %1089 = vtanh.f32 %v197_v21 }
  0xf3   :  { %v1090_v22 = vpop.eup %1089 }
  0xf4   :  { %200 = vst.msk [vmem:[#allocation3] sm:$0x3] %vm199_vm3, %v1090_v22  ;;  %955 = vmatmul.mubr.msk.f32.vlgmr.msra.gmra.mrb[2].mxu0 %vm116_vm2, %v1090_v22 }
  0xf5   :  { %1054 = vmatpush3.bf16.msra.mxu0 %v1162_v8  ;;  %976 = vmatprep.mubr.msk.f32.mxu0 %vm1106_vm1, %v1107_v4 }
  0xf6   :  { %1055 = vmatprep.subr.bf16.mxu0 %v1105_v3 }
  0xf9   :  { %1057 = vmatpush3.bf16.msra.mxu0 %v1174_v12 }
  0xfa   :  { %1064 = vmatprep.subr.bf16.mxu0 %v1105_v3 }
 0x1c7   :  { %v275_v24 = vpop.f32.mrb[2].mxu0 }
 0x1c8   :  { %v279_v25 = vadd.f32 %v275_v24, %v201_v23  ;;  %v956_v26 = vpop.f32.mrb[3].mxu0 }
 0x1ca   :  { %1091 = vtanh.f32 %v279_v25 }
 0x1d4   :  { %v1092_v27 = vpop.eup %1091 }
 0x1d5   :  { %281 = vst.msk [vmem:[#allocation3 + $0x2] sm:$0x3] %vm199_vm3, %v1092_v27  ;;  %966 = vmatmul.mubr.msk.f32.vlgmr.msra.gmra.mrb[2].mxu1 %vm116_vm2, %v1092_v27 }
 0x1d6   :  { %1060 = vmatpush3.bf16.msra.mxu1 %v1162_v8  ;;  %987 = vmatprep.mubr.msk.f32.mxu1 %vm1106_vm1, %v1107_v4 }
 0x1d7   :  { %1061 = vmatprep.subr.bf16.mxu1 %v1105_v3 }
 0x1da   :  { %1063 = vmatpush3.bf16.msra.mxu1 %v1174_v12 }
 0x1db   :  { %1070 = vmatprep.subr.bf16.mxu1 %v1105_v3 }
 0x2a8   :  { %v356_v29 = vpop.f32.mrb[2].mxu1 }
 0x2a9   :  { %v360_v30 = vadd.f32 %v356_v29, %v282_v28  ;;  %v967_v31 = vpop.f32.mrb[3].mxu1 }
 0x2ab   :  { %1093 = vtanh.f32 %v360_v30 }
 0x2b5   :  { %v1094_v32 = vpop.eup %1093 }
 0x2b6   :  { %362 = vst.msk [vmem:[#allocation3 + $0x4] sm:$0x3] %vm199_vm3, %v1094_v32  ;;  %977 = vmatmul.mubr.msk.f32.vlgmr.msra.gmra.mrb[4].mxu0 %vm116_vm2, %v1094_v32 }
 0x2b7   :  { %1066 = vmatpush3.bf16.msra.mxu0 %v1162_v8  ;;  %998 = vmatprep.mubr.msk.f32.mxu0 %vm1106_vm1, %v1107_v4 }
 0x2b8   :  { %1067 = vmatprep.subr.bf16.mxu0 %v1105_v3 }
 0x2bb   :  { %1069 = vmatpush3.bf16.msra.mxu0 %v1174_v12 }
 0x2bc   :  { %1076 = vmatprep.subr.bf16.mxu0 %v1105_v3 }
 0x389   :  { %v437_v34 = vpop.f32.mrb[4].mxu0 }
 0x38a   :  { %v441_v35 = vadd.f32 %v437_v34, %v363_v33  ;;  %v978_v36 = vpop.f32.mrb[5].mxu0 }
 0x38c   :  { %1095 = vtanh.f32 %v441_v35 }
 0x396   :  { %v1096_v37 = vpop.eup %1095 }
 0x397   :  { %443 = vst.msk [vmem:[#allocation3 + $0x6] sm:$0x3] %vm199_vm3, %v1096_v37  ;;  %988 = vmatmul.mubr.msk.f32.vlgmr.msra.gmra.mrb[4].mxu1 %vm116_vm2, %v1096_v37 }
 0x398   :  { %1072 = vmatpush3.bf16.msra.mxu1 %v1162_v8  ;;  %1009 = vmatprep.mubr.msk.f32.mxu1 %vm1106_vm1, %v1107_v4 }
 0x399   :  { %1073 = vmatprep.subr.bf16.mxu1 %v1105_v3 }
 0x39c   :  { %1075 = vmatpush3.bf16.msra.mxu1 %v1174_v12 }
 0x39d   :  { %1083 = vmatprep.subr.bf16.mxu1 %v1082_v56 }
 0x39e   :  { %v768_v48 = vld [vmem:[#allocation3] sm:$0xff] }
 0x46a   :  { %v518_v39 = vpop.f32.mrb[4].mxu1 }
 0x46b   :  { %v522_v40 = vadd.f32 %v518_v39, %v444_v38  ;;  %v989_v41 = vpop.f32.mrb[5].mxu1 }
 0x46d   :  { %1097 = vtanh.f32 %v522_v40 }
 0x477   :  { %v1098_v42 = vpop.eup %1097 }
 0x478   :  { %524 = vst.msk [vmem:[#allocation3 + $0x8] sm:$0x3] %vm199_vm3, %v1098_v42  ;;  %999 = vmatmul.mubr.msk.f32.vlgmr.msra.gmra.mrb[6].mxu0 %vm116_vm2, %v1098_v42 }
 0x479   :  { %1078 = vmatpush3.bf16.msra.mxu0 %v1162_v8  ;;  %1020 = vmatprep.mubr.msk.f32.mxu0 %vm1106_vm1, %v1107_v4 }
 0x47a   :  { %1079 = vmatprep.subr.bf16.mxu0 %v1105_v3 }
 0x47d   :  { %1081 = vmatpush3.bf16.msra.mxu0 %v1174_v12 }
 0x54b   :  { %v599_v44 = vpop.f32.mrb[6].mxu0 }
 0x54c   :  { %v603_v45 = vadd.f32 %v599_v44, %v525_v43  ;;  %v1000_v46 = vpop.f32.mrb[7].mxu0 }
 0x54e   :  { %1099 = vtanh.f32 %v603_v45 }
 0x558   :  { %v1100_v47 = vpop.eup %1099 }
 0x559   :  { %605 = vst.msk [vmem:[#allocation3 + $0xa] sm:$0x3] %vm199_vm3, %v1100_v47  ;;  %1010 = vmatmul.mubr.msk.f32.vlgmr.msra.gmra.mrb[6].mxu1 %vm116_vm2, %v1100_v47 }
 0x55a   :  { %1027 = vmatprep.mubr.msk.f32.mxu1 %vm34_vm0, %v768_v48  ;;  %1085 = vmatpush3.bf16.msra.mxu1 %v1082_v56 }
 0x62c   :  { %v680_v50 = vpop.f32.mrb[6].mxu1 }
 0x62d   :  { %v684_v51 = vadd.f32 %v680_v50, %v606_v49  ;;  %v1011_v52 = vpop.f32.mrb[7].mxu1 }
 0x62f   :  { %1101 = vtanh.f32 %v684_v51 }
 0x639   :  { %v1102_v53 = vpop.eup %1101 }
 0x63a   :  { %686 = vst.msk [vmem:[#allocation3 + $0xc] sm:$0x3] %vm199_vm3, %v1102_v53  ;;  %1021 = vmatmul.mubr.msk.f32.vlgmr.msra.gmra.mrb[8].mxu0 %vm116_vm2, %v1102_v53 }
 0x70d   :  { %v761_v58 = vpop.f32.mrb[8].mxu0 }
 0x70e   :  { %v765_v59 = vadd.f32 %v761_v58, %v687_v57  ;;  %v1022_v60 = vpop.f32.mrb[9].mxu0 }
 0x710   :  { %1103 = vtanh.f32 %v765_v59 }
 0x71a   :  { %v1104_v61 = vpop.eup %1103 }
 0x71b   :  { %767 = vst.msk [vmem:[#allocation3 + $0xe] sm:$0x3] %vm199_vm3, %v1104_v61 }
 0x722   :  { %v769_v62 = vld [vmem:[#allocation3 + $0x8] sm:$0xff] }
 0x723   :  { %1028 = vmatmul.mubr.msk.f32.vlgmr.msra.gmra.mrb[8].mxu1 %vm34_vm0, %v769_v62 }
 0x7f6   :  { %v1029_v0 = vpop.f32.mrb[8].mxu1 }
 0x7f7   :  { %v857_v1 = vadd.f32 %v1029_v0, %v877_v63  ;;  %v851_v2 = vpop.f32.mrb[9].mxu1 }
 0x7f8   :  { %v852_v3 = vadd.f32 %v877_v63, %v851_v2 }
 0x7f9   :  { %862 = vst.msk [vmem:[%s1265_s6 + $0x8] sm:$0xff] %vm860_vm4, %v857_v1 }
 0x7fa   :  { %861 = vst.msk [vmem:[%s1265_s6] sm:$0xff] %vm860_vm4, %v852_v3 }

</bundles_post_ra>
